<compile_context>
chip_gen: v7x
topology: tpu7x:2x2x1
jax: 0.10.0
libtpu: 0.0.40
codegen_flags: <defaults>
</compile_context>

<pallas_src>
import functools

import jax
import jax.numpy as jnp
from jax.experimental import pallas as pl
from jax.experimental.pallas import tpu as pltpu

_SUBLANE_F32 = 8  # f32 sublane quantum; the HBM streams stay f32 (a bf16 stream would need 16)


def _round_up(v, m):
    return (v + m - 1) // m * m


def _mlp_kernel(x_ref, w1_ref, b1_ref, w2_ref, b2_ref, o_ref, *, use_bf16):
    # x:  [TB, D] f32    w1: [D, H] f32    b1: [1, H] f32
    # w2: [H, C]  f32    b2: [1, C] f32    o:  [TB, C] f32
    x = x_ref[...]
    w1 = w1_ref[...]
    w2 = w2_ref[...]
    if use_bf16:
        # Optional bf16 MXU path: cast in vregs (VPU, free slack) -- no extra HBM bytes.
        x = x.astype(jnp.bfloat16)
        w1 = w1.astype(jnp.bfloat16)
        w2 = w2.astype(jnp.bfloat16)

    # Hidden layer on the MXU, f32 accumulation.
    h = jnp.dot(x, w1, preferred_element_type=jnp.float32) + b1_ref[...]
    # ReLU on the VPU.
    h = jnp.maximum(h, 0.0)
    # Dropout (eval mode) == identity.
    if use_bf16:
        h = h.astype(jnp.bfloat16)
    # Output layer on the MXU; true C lanes (masked store is negligible for small C).
    out = jnp.dot(h, w2, preferred_element_type=jnp.float32) + b2_ref[...]
    o_ref[...] = out.astype(o_ref.dtype)


def mlp_classifier_forward(x, w1, b1, w2, b2, *, block_b=4096, use_bf16_matmul=False):
    """Fused MLP forward: ReLU(x @ w1 + b1) @ w2 + b2 (dropout in eval mode).

    Args:
      x:  [B, D] float32
      w1: [D, H] float32   (transposed PyTorch weight of first Linear)
      b1: [H]    float32
      w2: [H, C] float32   (transposed PyTorch weight of second Linear)
      b2: [C]    float32
      block_b: max batch-tile rows per grid step (sweep 2048-8192 for very large B).
      use_bf16_matmul: cast operands to bf16 *inside* the kernel (faster MXU, looser
        numerics); default False for PyTorch f32 nn.Linear parity.
    Returns:
      [B, C] float32
    """
    B, D = x.shape
    H = w1.shape[1]
    C = w2.shape[1]

    # Batch tile: multiple of the f32 sublane quantum, capped so the grid has >= ~4
    # steps when B allows it (pipeline overlap + v7x megacore), and capped at block_b.
    tb_cap = _round_up(max(pl.cdiv(B, 4), 1), _SUBLANE_F32)
    TB = max(_SUBLANE_F32, min(_round_up(block_b, _SUBLANE_F32), tb_cap))
    grid = (pl.cdiv(B, TB),)  # ragged last block handled by Pallas (no host padding)

    # Biases as [1, N] rows for clean VMEM layout (tiny, negligible per-call cost).
    b1_2d = b1.reshape(1, H).astype(jnp.float32)
    b2_2d = b2.reshape(1, C).astype(jnp.float32)

    # VMEM budget: double-buffered x/out tiles + resident (conservatively x2) weights.
    tile_bytes = 2 * (TB * D * 4 + TB * C * 4)
    weight_bytes = 2 * (D * H + H + H * C + C) * 4
    needed = tile_bytes + weight_bytes
    vmem_limit = None
    if needed > 12 * 1024 * 1024:  # above the smallest (v5e) scoped-VMEM default
        try:
            phys = pltpu.get_tpu_info().vmem_capacity_bytes  # per-generation cap (64 MiB on v7x)
        except Exception:  # pragma: no cover - conservative fallback
            phys = 64 * 1024 * 1024
        vmem_limit = min(int(needed * 3 // 2), int(phys * 3 // 4))

    cost = pl.CostEstimate(
        flops=2 * B * (D * H + H * C),
        transcendentals=0,
        bytes_accessed=(x.size * 4 + w1.size * 4 + b1.size * 4
                        + w2.size * 4 + b2.size * 4 + B * C * 4),
    )

    kernel = functools.partial(_mlp_kernel, use_bf16=use_bf16_matmul)

    return pl.pallas_call(
        kernel,
        out_shape=jax.ShapeDtypeStruct((B, C), jnp.float32),
        grid=grid,
        in_specs=[
            pl.BlockSpec((TB, D), lambda i: (i, 0)),   # x: tiled over batch (pipelined)
            pl.BlockSpec((D, H), lambda i: (0, 0)),    # weights/biases: VMEM-resident
            pl.BlockSpec((1, H), lambda i: (0, 0)),
            pl.BlockSpec((H, C), lambda i: (0, 0)),
            pl.BlockSpec((1, C), lambda i: (0, 0)),
        ],
        out_specs=pl.BlockSpec((TB, C), lambda i: (i, 0)),   # true [B, C] output, no lane padding
        compiler_params=pltpu.CompilerParams(
            dimension_semantics=("parallel",),               # megacore sharding on v7x
            vmem_limit_bytes=vmem_limit,
        ),
        cost_estimate=cost,
    )(x.astype(jnp.float32), w1.astype(jnp.float32), b1_2d, w2.astype(jnp.float32), b2_2d)


def init_mlp_params(key, input_dim, hidden_dim=64, num_classes=1):
    """Deterministic init mimicking nn.Linear default (uniform(-1/sqrt(fan_in), 1/sqrt(fan_in)))."""
    k1, k2, k3, k4 = jax.random.split(key, 4)
    bound1 = 1.0 / (input_dim ** 0.5)
    bound2 = 1.0 / (hidden_dim ** 0.5)
    # Stored already transposed to [in, out] layout for the kernel.
    w1 = jax.random.uniform(k1, (input_dim, hidden_dim), jnp.float32, -bound1, bound1)
    b1 = jax.random.uniform(k2, (hidden_dim,), jnp.float32, -bound1, bound1)
    w2 = jax.random.uniform(k3, (hidden_dim, num_classes), jnp.float32, -bound2, bound2)
    b2 = jax.random.uniform(k4, (num_classes,), jnp.float32, -bound2, bound2)
    return w1, b1, w2, b2


def _reference(x, w1, b1, w2, b2):
    # f32 reference matching PyTorch nn.Linear numerics.
    hi = jax.lax.Precision.HIGHEST
    h = jnp.dot(x, w1, precision=hi) + b1
    h = jnp.maximum(h, 0.0)
    return jnp.dot(h, w2, precision=hi) + b2


if __name__ == "__main__":
    key = jax.random.PRNGKey(0)
    kx, kp = jax.random.split(key)

    B, D, H, C = 2, 32, 64, 1
    x = jax.random.normal(kx, (B, D), jnp.float32)
    w1, b1, w2, b2 = init_mlp_params(kp, D, H, C)

    out = jax.block_until_ready(mlp_classifier_forward(x, w1, b1, w2, b2))
    ref = _reference(x, w1, b1, w2, b2)
    assert out.shape == (B, C)
    # Loose-ish tolerance covers possible MXU f32 multi-pass accumulation differences.
    assert jnp.allclose(out, ref, atol=1e-2, rtol=1e-2), (out, ref)

    # Multi-step grid + ragged last block (B not a multiple of the batch tile).
    B2 = 20
    x2 = jax.random.normal(jax.random.PRNGKey(1), (B2, D), jnp.float32)
    out2 = jax.block_until_ready(mlp_classifier_forward(x2, w1, b1, w2, b2))
    ref2 = _reference(x2, w1, b1, w2, b2)
    assert out2.shape == (B2, C)
    assert jnp.allclose(out2, ref2, atol=1e-2, rtol=1e-2), (out2, ref2)

    print("KERNEL_OK")
</pallas_src>

<mosaic_0001>
module attributes {stable_mosaic.version = 11 : i64} {
  func.func @_mlp_kernel(%arg0: i32, %arg1: memref<8x32xf32, #tpu.memory_space<vmem>>, %arg2: memref<32x64xf32, #tpu.memory_space<vmem>>, %arg3: memref<1x64xf32, #tpu.memory_space<vmem>>, %arg4: memref<64x1xf32, #tpu.memory_space<vmem>>, %arg5: memref<1x1xf32, #tpu.memory_space<vmem>>, %arg6: memref<8x1xf32, #tpu.memory_space<vmem>>) attributes {dimension_semantics = [#tpu.dimension_semantics<parallel>], iteration_bounds = array<i64: 1>, scalar_prefetch = 0 : i64, scratch_operands = 0 : i64, tpu.core_type = #tpu.core_type<tc>, window_params = [{transform_indices = @transform_0, window_bounds = array<i64: 8, 32>}, {pipeline_mode = #tpu.pipeline_mode<synchronous>, transform_indices = @transform_1, window_bounds = array<i64: 32, 64>}, {pipeline_mode = #tpu.pipeline_mode<synchronous>, transform_indices = @transform_2, window_bounds = array<i64: 1, 64>}, {pipeline_mode = #tpu.pipeline_mode<synchronous>, transform_indices = @transform_3, window_bounds = array<i64: 64, 1>}, {pipeline_mode = #tpu.pipeline_mode<synchronous>, transform_indices = @transform_4, window_bounds = array<i64: 1, 1>}, {transform_indices = @transform_5, window_bounds = array<i64: 8, 1>}]} {
    %c0 = arith.constant 0 : index
    %c0_0 = arith.constant 0 : index
    %0 = vector.load %arg1[%c0, %c0_0] : memref<8x32xf32, #tpu.memory_space<vmem>>, vector<8x32xf32>
    %c0_1 = arith.constant 0 : index
    %c0_2 = arith.constant 0 : index
    %1 = vector.load %arg2[%c0_1, %c0_2] : memref<32x64xf32, #tpu.memory_space<vmem>>, vector<32x64xf32>
    %c0_3 = arith.constant 0 : index
    %c0_4 = arith.constant 0 : index
    %2 = vector.load %arg4[%c0_3, %c0_4] : memref<64x1xf32, #tpu.memory_space<vmem>>, vector<64x1xf32>
    %cst = arith.constant dense<0.000000e+00> : vector<8x64xf32>
    %3 = tpu.matmul %0, %1, %cst {dimension_numbers = #tpu.dot_dimension_numbers<[1], [0], [0], [1], [0, 0, 1, 1], [], []>} : vector<8x32xf32>, vector<32x64xf32>, vector<8x64xf32> -> vector<8x64xf32>
    %c0_5 = arith.constant 0 : index
    %c0_6 = arith.constant 0 : index
    %4 = vector.load %arg3[%c0_5, %c0_6] : memref<1x64xf32, #tpu.memory_space<vmem>>, vector<1x64xf32>
    %5 = vector.broadcast %4 : vector<1x64xf32> to vector<8x64xf32>
    %6 = arith.addf %3, %5 : vector<8x64xf32>
    %cst_7 = arith.constant 0.000000e+00 : f32
    %7 = vector.broadcast %cst_7 : f32 to vector<8x64xf32>
    %8 = arith.maximumf %6, %7 : vector<8x64xf32>
    %cst_8 = arith.constant dense<0.000000e+00> : vector<8x1xf32>
    %9 = tpu.matmul %8, %2, %cst_8 {dimension_numbers = #tpu.dot_dimension_numbers<[1], [0], [0], [1], [0, 0, 1, 1], [], []>} : vector<8x64xf32>, vector<64x1xf32>, vector<8x1xf32> -> vector<8x1xf32>
    %c0_9 = arith.constant 0 : index
    %c0_10 = arith.constant 0 : index
    %10 = vector.load %arg5[%c0_9, %c0_10] : memref<1x1xf32, #tpu.memory_space<vmem>>, vector<1x1xf32>
    %11 = vector.broadcast %10 : vector<1x1xf32> to vector<8x1xf32>
    %12 = arith.addf %9, %11 : vector<8x1xf32>
    %c0_11 = arith.constant 0 : index
    %c0_12 = arith.constant 0 : index
    %13 = vector.load %arg6[%c0_11, %c0_12] : memref<8x1xf32, #tpu.memory_space<vmem>>, vector<8x1xf32>
    tpu.vector_store %arg6[%c0_11, %c0_12], %12 {strides = array<i32>} : memref<8x1xf32, #tpu.memory_space<vmem>>, vector<8x1xf32>,
    return
  }
  func.func @transform_0(%arg0: i32) -> (i32, i32) {
    %c0_i32 = arith.constant 0 : i32
    %c0_i32_0 = arith.constant 0 : i32
    return %arg0, %c0_i32 : i32, i32
  }
  func.func @transform_1(%arg0: i32) -> (i32, i32) {
    %c0_i32 = arith.constant 0 : i32
    %c0_i32_0 = arith.constant 0 : i32
    %c0_i32_1 = arith.constant 0 : i32
    return %c0_i32, %c0_i32_0 : i32, i32
  }
  func.func @transform_2(%arg0: i32) -> (i32, i32) {
    %c0_i32 = arith.constant 0 : i32
    %c0_i32_0 = arith.constant 0 : i32
    %c0_i32_1 = arith.constant 0 : i32
    return %c0_i32, %c0_i32_0 : i32, i32
  }
  func.func @transform_3(%arg0: i32) -> (i32, i32) {
    %c0_i32 = arith.constant 0 : i32
    %c0_i32_0 = arith.constant 0 : i32
    %c0_i32_1 = arith.constant 0 : i32
    return %c0_i32, %c0_i32_0 : i32, i32
  }
  func.func @transform_4(%arg0: i32) -> (i32, i32) {
    %c0_i32 = arith.constant 0 : i32
    %c0_i32_0 = arith.constant 0 : i32
    %c0_i32_1 = arith.constant 0 : i32
    return %c0_i32, %c0_i32_0 : i32, i32
  }
  func.func @transform_5(%arg0: i32) -> (i32, i32) {
    %c0_i32 = arith.constant 0 : i32
    %c0_i32_0 = arith.constant 0 : i32
    return %arg0, %c0_i32 : i32, i32
  }
}

</mosaic_0001>

<bundles_post_ra>
// kernel: tpu_custom_call.1
= control target key start
LH: loop header
LB: loop body
LE: loop exit
PB: predicated region body
PF: predicated region fallthrough
CT: control target
= control target key end

     0   :  { %s389_s0 = inlined_call_operand.vmem [shape: f32[2,32], index: 0, kind: input, shape index: {}]   ;;  %s390_s1 = inlined_call_operand.vmem [shape: f32[32,64], index: 1, kind: input, shape index: {}]   ;;  %s391_s2 = inlined_call_operand.vmem [shape: f32[1,64], index: 2, kind: input, shape index: {}]   ;;  %s392_s3 = inlined_call_operand.vmem [shape: f32[64,1], index: 3, kind: input, shape index: {}]   ;;  %s393_s4 = inlined_call_operand.<no memory space> [shape: f32[1,1], index: 4, kind: input, shape index: {}]   ;;  %s394_s5 = inlined_call_operand.vmem [shape: f32[2,1], index: 5, kind: output, shape index: {}]  }
   0x1   :  { %v10_v0 = vstv %s393_s4 }
   0x2   :  { %11 = vst [vmem:[#allocation2] sm:$0x1] %v10_v0 }
   0x3   :  { %v23_v1 = vld [vmem:[%s390_s1] sm:$0xff]  ;;  %v24_v2 = vld [vmem:[%s390_s1 + $0x8] sm:$0xff]  ;;  %v25_v3 = vld [vmem:[%s390_s1 + $0x10] sm:$0xff]  ;;  %v308_v4 = vmov 0.0|0.0   ;;  %vm309_vm0 = vmmov 0   ;;  %v310_v7 = vmov 0.0  }
   0x4   :  { %287 = vmatprep.subr.bf16.mxu0 %v308_v4  ;;  %v288_v5 = vpack.c.bf16 %v24_v2, %v23_v1  ;;  %v26_v6 = vld [vmem:[%s390_s1 + $0x18] sm:$0xff]  ;;  %265 = vmatprep.mubr.msk.f32.mxu0 %vm309_vm0, %v310_v7  ;;  %v27_v8 = vld [vmem:[%s392_s3] sm:$0xff]  ;;  %v28_v9 = vld [vmem:[%s392_s3 + $0x8] sm:$0xff]  ;;  %vm42_vm1 = vcmask 261120   ;;  %vm124_vm2 = vcmask 523264   ;;  %vm198_vm3 = vcmask 7168  }
   0x5   :  { %293 = vmatprep.subr.bf16.mxu1 %v308_v4  ;;  %v29_v10 = vld [vmem:[%s392_s3 + $0x10] sm:$0xff]  ;;  %v30_v11 = vld [vmem:[%s392_s3 + $0x18] sm:$0xff]  ;;  %284 = vmatprep.mubr.msk.f32.mxu1 %vm309_vm0, %v310_v7  ;;  %v291_v12 = vpack.c.bf16 %v26_v6, %v25_v3  ;;  %v294_v13 = vpack.c.bf16 %v28_v9, %v27_v8  ;;  %v31_v15 = vld [vmem:[%s392_s3 + $0x20] sm:$0xff] }
   0x6   :  { %289 = vmatpush3.bf16.msra.mxu0 %v288_v5  ;;  %v297_v14 = vpack.c.bf16 %v30_v11, %v29_v10  ;;  %v32_v16 = vld [vmem:[%s392_s3 + $0x28] sm:$0xff]  ;;  %v22_v17 = vld [vmem:[%s389_s0] sm:$0xff]  ;;  %v33_v19 = vld [vmem:[%s392_s3 + $0x30] sm:$0xff] }
   0x7   :  { %290 = vmatprep.subr.bf16.mxu0 %v308_v4  ;;  %295 = vmatpush3.bf16.msra.mxu1 %v294_v13  ;;  %v300_v18 = vpack.c.bf16 %v32_v16, %v31_v15  ;;  %v34_v20 = vld [vmem:[%s392_s3 + $0x38] sm:$0xff]  ;;  %v239_v22 = vld [vmem:[%s391_s2] ss:$0 sm:$0xff] }
   0x8   :  { %296 = vmatprep.subr.bf16.mxu1 %v308_v4  ;;  %v303_v21 = vpack.c.bf16 %v34_v20, %v33_v19 }
   0x9   :  { %v241_v27 = vld [vmem:[#allocation2] ss:$0 sm:$0xff] }
   0xa   :  { %292 = vmatpush3.bf16.msra.mxu0 %v291_v12 }
   0xb   :  { %298 = vmatpush3.bf16.msra.mxu1 %v297_v14 }
   0xc   :  { %299 = vmatprep.subr.bf16.mxu1 %v308_v4 }
   0xd   :  { %266 = vmatmul.mubr.msk.f32.vlgmr.msra.gmra.mrb[0].mxu0 %vm42_vm1, %v22_v17 }
   0xf   :  { %301 = vmatpush3.bf16.msra.mxu1 %v300_v18 }
  0x10   :  { %302 = vmatprep.subr.bf16.mxu1 %v308_v4 }
  0x13   :  { %304 = vmatpush3.bf16.msra.mxu1 %v303_v21 }
  0xe0   :  { %v112_v23 = vpop.f32.mrb[0].mxu0 }
  0xe1   :  { %v113_v24 = vadd.f32 %v239_v22, %v112_v23  ;;  %v267_v25 = vpop.f32.mrb[1].mxu0 }
  0xe3   :  { %v116_v26 = vmax.f32 %v113_v24, 0.0 }
  0xe5   :  { %285 = vmatmul.mubr.msk.f32.vlgmr.msra.gmra.mrb[0].mxu1 %vm124_vm2, %v116_v26 }
 0x1b8   :  { %v194_v28 = vpop.f32.mrb[0].mxu1 }
 0x1b9   :  { %v195_v29 = vadd.f32 %v241_v27, %v194_v28  ;;  %v286_v30 = vpop.f32.mrb[1].mxu1 }
 0x1bb   :  { %199 = vst.msk [vmem:[#allocation3] sm:$0xff] %vm198_vm3, %v195_v29 }
 0x1c2   :  { %v217_v31 = vld [vmem:[#allocation3] sm:$0x3] }
 0x1c3   :  { %218 = vst [vmem:[%s394_s5] sm:$0x3] %v217_v31 }

</bundles_post_ra>
